<compile_context>
chip_gen: v5e
topology: v5e:2x2
jax: 0.10.0
libtpu: 0.0.40
codegen_flags: <defaults>
</compile_context>

<pallas_src>
import functools

import jax
import jax.numpy as jnp
from jax.experimental import pallas as pl
from jax.experimental.pallas import tpu as pltpu


def gnn_forward_kernel(a_ref, x_ref, w1_ref, b1_ref, w2_ref, b2_ref, o_ref,
                       *, n_nodes):
    """Fused: relu(A_hat @ (X W1) + b1) -> masked mean pool -> (pooled W2 + b2)."""
    # GCNConv: feature transform then normalized aggregation, f32 MXU accum.
    xw = jnp.dot(x_ref[...], w1_ref[...], preferred_element_type=jnp.float32)
    h = jnp.dot(a_ref[...], xw, preferred_element_type=jnp.float32) + b1_ref[...]
    h = jnp.maximum(h, 0.0)  # ReLU
    # TODO(synk): nn.Dropout(0.1) is identity in eval mode; not applied here.

    # global_mean_pool over the real (unpadded) node rows only.
    row_ids = jax.lax.broadcasted_iota(jnp.int32, h.shape, 0)
    h = jnp.where(row_ids < n_nodes, h, 0.0)
    pooled = jnp.sum(h, axis=0, keepdims=True) * (1.0 / n_nodes)  # (1, HID_PAD)

    # classifier: Linear(c_hidden, 3) (output columns beyond 3 stay zero).
    o_ref[...] = (
        jnp.dot(pooled, w2_ref[...], preferred_element_type=jnp.float32)
        + b2_ref[...]
    )


def gnn_forward(a_pad, x_pad, w1_pad, b1_pad, w2_pad, b2_pad, *, n_nodes):
    c_out_pad = w2_pad.shape[1]
    vmem_spec = pl.BlockSpec(memory_space=pltpu.MemorySpace.VMEM)
    return pl.pallas_call(
        functools.partial(gnn_forward_kernel, n_nodes=n_nodes),
        out_shape=jax.ShapeDtypeStruct((1, c_out_pad), jnp.float32),
        in_specs=[vmem_spec] * 6,
        out_specs=vmem_spec,
    )(a_pad, x_pad, w1_pad, b1_pad, w2_pad, b2_pad)


def gcn_norm_adjacency(edge_index, num_nodes):
    """Dense A_hat = D^{-1/2} (A + I) D^{-1/2}, PyG gcn_norm convention."""
    src, dst = edge_index[0], edge_index[1]
    loops = jnp.arange(num_nodes, dtype=src.dtype)
    src = jnp.concatenate([src, loops])
    dst = jnp.concatenate([dst, loops])
    deg = jnp.zeros((num_nodes,), jnp.float32).at[dst].add(1.0)
    dinv = jnp.where(deg > 0, jax.lax.rsqrt(deg), 0.0)
    norm = dinv[dst] * dinv[src]
    # a[i, j] weights the message j -> i.
    return jnp.zeros((num_nodes, num_nodes), jnp.float32).at[dst, src].add(norm)


def pad2d(x, rows, cols):
    r, c = x.shape
    return jnp.pad(x, ((0, rows - r), (0, cols - c)))


def reference_forward(x, a, w1, b1, w2, b2):
    """Pure-JAX reference of the same forward (single graph, eval mode)."""
    h = jnp.maximum(a @ (x @ w1) + b1, 0.0)
    pooled = jnp.mean(h, axis=0, keepdims=True)
    return pooled @ w2 + b2


if __name__ == "__main__":
    key = jax.random.PRNGKey(0)

    # Small shapes implied by the module: c_in=3, c_hidden=16, c_out=3.
    N_NODES, C_IN, C_HID, C_OUT = 6, 3, 16, 3
    LANE = 128          # lane-dense feature padding
    N_PAD = 8           # sublane-aligned node padding

    # Deterministic small graph (ring over 6 nodes + a chord, both directions).
    src = jnp.array([0, 1, 1, 2, 2, 3, 3, 4, 4, 5, 5, 0, 0, 3], dtype=jnp.int32)
    dst = jnp.array([1, 0, 2, 1, 3, 2, 4, 3, 5, 4, 0, 5, 3, 0], dtype=jnp.int32)
    edge_index = jnp.stack([src, dst])

    k_x, k_w1, k_b1, k_w2, k_b2 = jax.random.split(key, 5)
    x = jax.random.normal(k_x, (N_NODES, C_IN), jnp.float32)
    w1 = jax.random.normal(k_w1, (C_IN, C_HID), jnp.float32) / jnp.sqrt(C_IN)
    b1 = 0.1 * jax.random.normal(k_b1, (C_HID,), jnp.float32)
    w2 = jax.random.normal(k_w2, (C_HID, C_OUT), jnp.float32) / jnp.sqrt(C_HID)
    b2 = 0.1 * jax.random.normal(k_b2, (C_OUT,), jnp.float32)

    # Host-side graph preprocessing (sparse scatter -> dense normalized adj).
    a_hat = gcn_norm_adjacency(edge_index, N_NODES)

    # Zero-pad everything to lane/sublane-friendly shapes.
    a_pad = pad2d(a_hat, N_PAD, N_PAD)
    x_pad = pad2d(x, N_PAD, LANE)
    w1_pad = pad2d(w1, LANE, LANE)
    b1_pad = pad2d(b1[None, :], 1, LANE)
    w2_pad = pad2d(w2, LANE, LANE)
    b2_pad = pad2d(b2[None, :], 1, LANE)

    out_pad = gnn_forward(a_pad, x_pad, w1_pad, b1_pad, w2_pad, b2_pad,
                          n_nodes=N_NODES)
    out_pad = jax.block_until_ready(out_pad)
    out = out_pad[:, :C_OUT]                      # (1, 3) — (num_graphs, c_out)

    ref = reference_forward(x, a_hat, w1, b1, w2, b2)
    assert out.shape == (1, C_OUT)
    assert jnp.allclose(out, ref, atol=1e-5, rtol=1e-5), "mismatch vs reference"
    # Padded output columns must stay exactly zero.
    assert jnp.all(out_pad[:, C_OUT:] == 0.0)

    print("KERNEL_OK")
</pallas_src>

<mosaic_0001>
module attributes {stable_mosaic.version = 11 : i64} {
  func.func @gnn_forward_kernel(%arg0: memref<8x8xf32, #tpu.memory_space<vmem>>, %arg1: memref<8x128xf32, #tpu.memory_space<vmem>>, %arg2: memref<128x128xf32, #tpu.memory_space<vmem>>, %arg3: memref<1x128xf32, #tpu.memory_space<vmem>>, %arg4: memref<128x128xf32, #tpu.memory_space<vmem>>, %arg5: memref<1x128xf32, #tpu.memory_space<vmem>>, %arg6: memref<1x128xf32, #tpu.memory_space<vmem>>) attributes {dimension_semantics = [], scalar_prefetch = 0 : i64, scratch_operands = 0 : i64, tpu.core_type = #tpu.core_type<tc>} {
    %c0 = arith.constant 0 : index
    %c0_0 = arith.constant 0 : index
    %0 = vector.load %arg1[%c0, %c0_0] : memref<8x128xf32, #tpu.memory_space<vmem>>, vector<8x128xf32>
    %c0_1 = arith.constant 0 : index
    %c0_2 = arith.constant 0 : index
    %1 = vector.load %arg2[%c0_1, %c0_2] : memref<128x128xf32, #tpu.memory_space<vmem>>, vector<128x128xf32>
    %cst = arith.constant dense<0.000000e+00> : vector<8x128xf32>
    %2 = tpu.matmul %0, %1, %cst {dimension_numbers = #tpu.dot_dimension_numbers<[1], [0], [0], [1], [0, 0, 1, 1], [], []>} : vector<8x128xf32>, vector<128x128xf32>, vector<8x128xf32> -> vector<8x128xf32>
    %c0_3 = arith.constant 0 : index
    %c0_4 = arith.constant 0 : index
    %3 = vector.load %arg0[%c0_3, %c0_4] : memref<8x8xf32, #tpu.memory_space<vmem>>, vector<8x8xf32>
    %cst_5 = arith.constant dense<0.000000e+00> : vector<8x128xf32>
    %4 = tpu.matmul %3, %2, %cst_5 {dimension_numbers = #tpu.dot_dimension_numbers<[1], [0], [0], [1], [0, 0, 1, 1], [], []>} : vector<8x8xf32>, vector<8x128xf32>, vector<8x128xf32> -> vector<8x128xf32>
    %c0_6 = arith.constant 0 : index
    %c0_7 = arith.constant 0 : index
    %5 = vector.load %arg3[%c0_6, %c0_7] : memref<1x128xf32, #tpu.memory_space<vmem>>, vector<1x128xf32>
    %6 = vector.broadcast %5 : vector<1x128xf32> to vector<8x128xf32>
    %7 = arith.addf %4, %6 : vector<8x128xf32>
    %cst_8 = arith.constant 0.000000e+00 : f32
    %8 = vector.broadcast %cst_8 : f32 to vector<8x128xf32>
    %9 = arith.maximumf %7, %8 : vector<8x128xf32>
    %10 = tpu.iota {dimensions = array<i32: 0>} : vector<8x128xi32>
    %c6_i32 = arith.constant 6 : i32
    %11 = vector.broadcast %c6_i32 : i32 to vector<8x128xi32>
    %12 = arith.cmpi slt, %10, %11 : vector<8x128xi32>
    %cst_9 = arith.constant 0.000000e+00 : f32
    %13 = vector.broadcast %cst_9 : f32 to vector<8x128xf32>
    %14 = arith.select %12, %9, %13 : vector<8x128xi1>, vector<8x128xf32>
    %cst_10 = arith.constant dense<0.000000e+00> : vector<128xf32>
    %15 = vector.multi_reduction <add>, %14, %cst_10 [0] : vector<8x128xf32> to vector<128xf32>
    %16 = vector.shape_cast %15 : vector<128xf32> to vector<1x128xf32>
    %cst_11 = arith.constant 0.166666672 : f32
    %17 = vector.broadcast %cst_11 : f32 to vector<1x128xf32>
    %18 = arith.mulf %16, %17 : vector<1x128xf32>
    %c0_12 = arith.constant 0 : index
    %c0_13 = arith.constant 0 : index
    %19 = vector.load %arg4[%c0_12, %c0_13] : memref<128x128xf32, #tpu.memory_space<vmem>>, vector<128x128xf32>
    %cst_14 = arith.constant dense<0.000000e+00> : vector<1x128xf32>
    %20 = tpu.matmul %18, %19, %cst_14 {dimension_numbers = #tpu.dot_dimension_numbers<[1], [0], [0], [1], [0, 0, 1, 1], [], []>} : vector<1x128xf32>, vector<128x128xf32>, vector<1x128xf32> -> vector<1x128xf32>
    %c0_15 = arith.constant 0 : index
    %c0_16 = arith.constant 0 : index
    %21 = vector.load %arg5[%c0_15, %c0_16] : memref<1x128xf32, #tpu.memory_space<vmem>>, vector<1x128xf32>
    %22 = arith.addf %20, %21 : vector<1x128xf32>
    %c0_17 = arith.constant 0 : index
    %c0_18 = arith.constant 0 : index
    %23 = vector.load %arg6[%c0_17, %c0_18] : memref<1x128xf32, #tpu.memory_space<vmem>>, vector<1x128xf32>
    tpu.vector_store %arg6[%c0_17, %c0_18], %22 {strides = array<i32>} : memref<1x128xf32, #tpu.memory_space<vmem>>, vector<1x128xf32>,
    return
  }
}

</mosaic_0001>

<bundles_post_ra>
// kernel: tpu_custom_call.1
= control target key start
LH: loop header
LB: loop body
LE: loop exit
PB: predicated region body
PF: predicated region fallthrough
CT: control target
= control target key end

     0   :  { %11 = vsyncpa [#allocation3], 0  ;;  %s418_s0 = inlined_call_operand.hbm [shape: f32[8,8], index: 0, kind: input, shape index: {}]   ;;  %s419_s1 = inlined_call_operand.hbm [shape: f32[8,128], index: 1, kind: input, shape index: {}]   ;;  %s420_s2 = inlined_call_operand.hbm [shape: f32[128,128], index: 2, kind: input, shape index: {}]   ;;  %s421_s3 = inlined_call_operand.vmem [shape: f32[1,128], index: 3, kind: input, shape index: {}]   ;;  %s422_s4 = inlined_call_operand.hbm [shape: f32[128,128], index: 4, kind: input, shape index: {}]   ;;  %s423_s5 = inlined_call_operand.vmem [shape: f32[1,128], index: 5, kind: input, shape index: {}]   ;;  %s424_s6 = inlined_call_operand.hbm [shape: f32[1,128], index: 6, kind: output, shape index: {}]  }
   0x1   :  { %12 = vsyncpa [#allocation6], 0 }
   0x2   :  { %13 = vsyncpa [#allocation9], 0  ;;  %s31_s23 = sshll.u32 %s419_s1, 4  ;;  %s32_s23 = int_to_ptr.hbm [resolvable:$true] %s31_s23 }
   0x3   :  { %14 = vsyncpa [#allocation4], 0  ;;  %s355_s24 = smov [#allocation5]   ;;  %s20_s28 = sshll.u32 %s418_s0, 4  ;;  %s21_s28 = int_to_ptr.hbm [resolvable:$true] %s20_s28 }
   0x4   :  { %s33_s25 = sshll.u32 %s355_s24, 4  ;;  %s356_s29 = smov [#allocation2]   ;;  %s34_s25 = int_to_ptr.vmem [resolvable:$true] %s33_s25 }
   0x5   :  { %36 = dma.hbm_to_vmem [thread:$0]  %s32_s23, 128, %s34_s25, [#allocation6]  }
   0x6   :  { %s22_s30 = sshll.u32 %s356_s29, 4  ;;  %s41_s9 = sshll.u32 %s420_s2, 4  ;;  %s23_s30 = int_to_ptr.vmem [resolvable:$true] %s22_s30  ;;  %s42_s9 = int_to_ptr.hbm [resolvable:$true] %s41_s9 }
   0x7   :  { %25 = dma.hbm_to_vmem [thread:$0]  %s21_s28, 128, %s23_s30, [#allocation3]  }
   0x8   :  { %s357_s1 = smov [#allocation7]   ;;  %s56_s13 = sshll.u32 %s422_s4, 4  ;;  %s57_s13 = int_to_ptr.hbm [resolvable:$true] %s56_s13 }
   0x9   :  { %s43_s10 = sshll.u32 %s357_s1, 4  ;;  %s358_s14 = smov 128   ;;  %s44_s10 = int_to_ptr.vmem [resolvable:$true] %s43_s10 }
   0xa   :  { %s359_s0 = smov 8   ;;  %s360_s15 = smov [#allocation8]  }
   0xb   :  { %49 = dma.hbm_to_vmem [thread:$0]  %s42_s9, 2048, %s44_s10, [#allocation6], %s358_s14, %s358_s14, %s359_s0  }
   0xc   :  { %s58_s16 = sshll.u32 %s360_s15, 4  ;;  %s59_s16 = int_to_ptr.vmem [resolvable:$true] %s58_s16 }
   0xd   :  { %64 = dma.hbm_to_vmem [thread:$0]  %s57_s13, 2048, %s59_s16, [#allocation9], %s358_s14, %s358_s14, %s359_s0  }
   0xe   :  { %347 = dma.done.wait [#allocation3], 128  }
   0xf   :  { %348 = vsyncadd [#allocation3], 4294967168 }
  0x10   :  { %349 = dma.done.wait [#allocation6], 2176  }
  0x11   :  { %350 = vsyncadd [#allocation6], 4294965120 }
  0x12   :  { %351 = dma.done.wait [#allocation9], 2048  }
  0x13   :  { %352 = vsyncadd [#allocation9], 4294965248  ;;  %v99_v0 = vld [vmem:[#allocation7 + $0x78] sm:$0xff]  ;;  %v98_v1 = vld [vmem:[#allocation7 + $0x70] sm:$0xff]  ;;  %vm125_vm0 = vcmask 64512   ;;  %v150_v35 = vlaneseq  ;;  %s361_s19 = smov [#allocation10]  }
  0x14   :  { %100 = vmatpush.msra.mxu0 %v99_v0  ;;  %v97_v2 = vld [vmem:[#allocation7 + $0x68] sm:$0xff]  ;;  %v96_v3 = vld [vmem:[#allocation7 + $0x60] sm:$0xff]  ;;  %v95_v4 = vld [vmem:[#allocation7 + $0x58] sm:$0xff]  ;;  %s206_s22 = sshll.u32 %s424_s6, 4  ;;  %s207_s22 = int_to_ptr.hbm [resolvable:$true] %s206_s22 }
  0x15   :  { %v94_v5 = vld [vmem:[#allocation7 + $0x50] sm:$0xff]  ;;  %v93_v6 = vld [vmem:[#allocation7 + $0x48] sm:$0xff]  ;;  %v92_v7 = vld [vmem:[#allocation7 + $0x40] sm:$0xff]  ;;  %v151_v37 = vshrl.u32 %v150_v35, 7 }
  0x16   :  { %101 = vmatpush.msra.mxu0 %v98_v1  ;;  %v91_v8 = vld [vmem:[#allocation7 + $0x38] sm:$0xff]  ;;  %v90_v9 = vld [vmem:[#allocation7 + $0x30] sm:$0xff]  ;;  %v89_v10 = vld [vmem:[#allocation7 + $0x28] sm:$0xff] }
  0x17   :  { %v88_v11 = vld [vmem:[#allocation7 + $0x20] sm:$0xff]  ;;  %v87_v12 = vld [vmem:[#allocation7 + $0x18] sm:$0xff]  ;;  %v86_v13 = vld [vmem:[#allocation7 + $0x10] sm:$0xff]  ;;  %vm152_vm1 = vcmp.lt.s32.totalorder %v151_v37, 6 }
  0x18   :  { %102 = vmatpush.msra.mxu0 %v97_v2  ;;  %v85_v14 = vld [vmem:[#allocation7 + $0x8] sm:$0xff]  ;;  %v84_v15 = vld [vmem:[#allocation7] sm:$0xff]  ;;  %v83_v16 = vld [vmem:[#allocation5] sm:$0xff] }
  0x19   :  { %v176_v17 = vld [vmem:[#allocation8 + $0x78] sm:$0xff]  ;;  %v175_v18 = vld [vmem:[#allocation8 + $0x70] sm:$0xff]  ;;  %v174_v19 = vld [vmem:[#allocation8 + $0x68] sm:$0xff] }
  0x1a   :  { %103 = vmatpush.msra.mxu0 %v96_v3  ;;  %178 = vmatpush.msra.mxu2 %v176_v17  ;;  %v173_v20 = vld [vmem:[#allocation8 + $0x60] sm:$0xff]  ;;  %v172_v21 = vld [vmem:[#allocation8 + $0x58] sm:$0xff]  ;;  %v171_v22 = vld [vmem:[#allocation8 + $0x50] sm:$0xff] }
  0x1b   :  { %v120_v23 = vld [vmem:[#allocation2] sm:$0xff]  ;;  %v170_v25 = vld [vmem:[#allocation8 + $0x48] sm:$0xff]  ;;  %v169_v26 = vld [vmem:[#allocation8 + $0x40] sm:$0xff] }
  0x1c   :  { %104 = vmatpush.msra.mxu0 %v95_v4  ;;  %179 = vmatpush.msra.mxu2 %v175_v18  ;;  %v168_v27 = vld [vmem:[#allocation8 + $0x38] sm:$0xff]  ;;  %v167_v28 = vld [vmem:[#allocation8 + $0x30] sm:$0xff]  ;;  %v166_v29 = vld [vmem:[#allocation8 + $0x28] sm:$0xff] }
  0x1d   :  { %v165_v30 = vld [vmem:[#allocation8 + $0x20] sm:$0xff]  ;;  %v164_v31 = vld [vmem:[#allocation8 + $0x18] sm:$0xff]  ;;  %v163_v32 = vld [vmem:[#allocation8 + $0x10] sm:$0xff] }
  0x1e   :  { %105 = vmatpush.msra.mxu0 %v94_v5  ;;  %180 = vmatpush.msra.mxu2 %v174_v19  ;;  %v162_v33 = vld [vmem:[#allocation8 + $0x8] sm:$0xff]  ;;  %v161_v34 = vld [vmem:[#allocation8] sm:$0xff]  ;;  %v226_v36 = vld [vmem:[%s421_s3] ss:$0 sm:$0xff]  ;;  %s204_s3 = sshll.u32 %s361_s19, 4  ;;  %s205_s3 = int_to_ptr.vmem [resolvable:$true] %s204_s3 }
  0x1f   :  { %v177_v49 = vld [vmem:[%s423_s5] sm:$0x1] }
  0x20   :  { %106 = vmatpush.msra.mxu0 %v93_v6  ;;  %181 = vmatpush.msra.mxu2 %v173_v20 }
  0x22   :  { %107 = vmatpush.msra.mxu0 %v92_v7  ;;  %182 = vmatpush.msra.mxu2 %v172_v21 }
  0x24   :  { %108 = vmatpush.msra.mxu0 %v91_v8  ;;  %183 = vmatpush.msra.mxu2 %v171_v22 }
  0x26   :  { %109 = vmatpush.msra.mxu0 %v90_v9  ;;  %184 = vmatpush.msra.mxu2 %v170_v25 }
  0x28   :  { %110 = vmatpush.msra.mxu0 %v89_v10  ;;  %185 = vmatpush.msra.mxu2 %v169_v26 }
  0x2a   :  { %111 = vmatpush.msra.mxu0 %v88_v11  ;;  %186 = vmatpush.msra.mxu2 %v168_v27 }
  0x2c   :  { %112 = vmatpush.msra.mxu0 %v87_v12  ;;  %187 = vmatpush.msra.mxu2 %v167_v28 }
  0x2e   :  { %113 = vmatpush.msra.mxu0 %v86_v13  ;;  %188 = vmatpush.msra.mxu2 %v166_v29 }
  0x30   :  { %114 = vmatpush.msra.mxu0 %v85_v14  ;;  %189 = vmatpush.msra.mxu2 %v165_v30 }
  0x32   :  { %115 = vmatpush.msra.mxu0 %v84_v15  ;;  %190 = vmatpush.msra.mxu2 %v164_v31 }
  0x33   :  { %116 = vmatmul.f32.vlgmr.msra.gmra.mxu0 %v83_v16 }
  0x34   :  { %191 = vmatpush.msra.mxu2 %v163_v32 }
  0x36   :  { %192 = vmatpush.msra.mxu2 %v162_v33 }
  0x38   :  { %193 = vmatpush.msra.mxu2 %v161_v34 }
  0xb0   :  { %v117_v24 = vpop.f32.mrf.mxu0 }
  0xb1   :  { %144 = vmatpush.msra.mxu1 %v117_v24 }
  0xb2   :  { %218 = vmatmul.msk.f32.vlgmr.msra.gmra.mxu1 %vm125_vm0, %v120_v23 }
 0x12f   :  { %v146_v38 = vpop.f32.mrf.mxu1 }
 0x130   :  { %v147_v39 = vadd.f32 %v226_v36, %v146_v38 }
 0x132   :  { %v149_v40 = vmax.f32 %v147_v39, 0.0 }
 0x134   :  { %v153_v41 = vsel %vm152_vm1, %v149_v40, 0.0 }
 0x135   :  { %v154_v42 = vrot.slane %v153_v41, 4 }
 0x137   :  { %v155_v43 = vadd.f32 %v154_v42, %v153_v41 }
 0x139   :  { %v156_v44 = vrot.slane %v155_v43, 2 }
 0x13b   :  { %v157_v45 = vadd.f32 %v156_v44, %v155_v43 }
 0x13d   :  { %v158_v46 = vrot.slane %v157_v45, 1 }
 0x13f   :  { %v159_v47 = vadd.f32 %v158_v46, %v157_v45 }
 0x141   :  { %v160_v48 = vmul.f32 0.16666667, %v159_v47 }
 0x143   :  { %194 = vmatmul.f32.vlgmr.msra.gmra.mxu2 %v160_v48 }
 0x1c6   :  { %v195_v50 = vpop.f32.mrf.mxu2 }
 0x1c7   :  { %v196_v51 = vadd.f32 %v195_v50, %v177_v49 }
 0x1c9   :  { %198 = vst [vmem:[#allocation10] sm:$0x1] %v196_v51 }
 0x1ca   :  { %209 = dma.vmem_to_hbm [thread:$0]  %s205_s3, 16, %s207_s22, [#allocation4]  }
 0x1cb   :  { %353 = dma.done.wait [#allocation4], 16  }
 0x1cc   :  { %354 = vsyncadd [#allocation4], 4294967280 }
 0x1cd   :  { %214 = vsyncpa [#allocation3], 1 }
 0x1ce   :  { %215 = vsyncpa [#allocation6], 1 }
 0x1cf   :  { %216 = vsyncpa [#allocation9], 1 }
 0x1d0   :  { %217 = vsyncpa [#allocation4], 1 }

</bundles_post_ra>
